<compile_context>
chip_gen: v7x
topology: tpu7x:2x2x1
jax: 0.10.0
libtpu: 0.0.40
codegen_flags: <defaults>
</compile_context>

<pallas_src>
import functools

import jax
import jax.numpy as jnp
from jax import lax
from jax.experimental import pallas as pl
from jax.experimental.pallas import tpu as pltpu


def _round_up(x, m):
    return (x + m - 1) // m * m


def _pad_lanes(d):
    # 128-lane minimum; pad larger dims to 256 to feed the 256-wide MXU.
    return _round_up(d, 256) if d > 128 else 128


def _cbow_kernel(seq_len, vocab_pad,
                 ids_ref,    # VMEM (TB, S)        int32 — token ids for this tile
                 emb_ref,    # VMEM (V_pad, E_pad) bf16  — embedding table
                 w_ref,      # VMEM (E_pad, O_pad) bf16  — linear weight (E, O)
                 bias_ref,   # VMEM (1, O_pad)     f32   — lin_bias + extra bias
                 out_ref):   # VMEM (TB, O_pad)    f32
    tb = out_ref.shape[0]
    ids = ids_ref[...]                                       # (TB, S) int32
    iota_v = lax.broadcasted_iota(jnp.int32, (tb, vocab_pad), 1)

    # Bag-of-words counts: counts[b, v] = #{s : ids[b, s] == v}.
    # Fully vectorized; ids outside [0, V) (incl. padded rows' columns beyond
    # the real vocab) simply match nothing. seq_len is small & static.
    counts = jnp.zeros((tb, vocab_pad), jnp.float32)
    for s in range(seq_len):
        counts = counts + (ids[:, s:s + 1] == iota_v).astype(jnp.float32)

    # Embedding sum as an MXU matmul: (TB, V_pad) @ (V_pad, E_pad) -> f32.
    # Counts are small integers, exactly representable in bf16.
    summed = jnp.dot(counts.astype(jnp.bfloat16), emb_ref[...],
                     preferred_element_type=jnp.float32)

    # Linear layer + fused bias: bf16 MXU operands, f32 accumulation.
    out_ref[...] = (jnp.dot(summed.astype(jnp.bfloat16), w_ref[...],
                            preferred_element_type=jnp.float32)
                    + bias_ref[...]).astype(out_ref.dtype)


def prepare_cbow_params(emb_table, weight, lin_bias, extra_bias):
    """Pad + cast the model parameters once (hoisted out of the per-call path).

    emb_table:  (V, E) f32   embedding weight
    weight:     (E, O) f32   linear weight (transpose of torch's (O, E))
    lin_bias:   (1, O) f32   nn.Linear bias
    extra_bias: (1, O) f32   the module's extra `self.bias` parameter
    """
    V, E = emb_table.shape
    O = weight.shape[1]
    V_pad = _pad_lanes(V)
    E_pad = _pad_lanes(E)
    O_pad = _pad_lanes(O)

    emb_pad = jnp.zeros((V_pad, E_pad), jnp.bfloat16).at[:V, :E].set(
        emb_table.astype(jnp.bfloat16))
    w_pad = jnp.zeros((E_pad, O_pad), jnp.bfloat16).at[:E, :O].set(
        weight.astype(jnp.bfloat16))
    fused_bias = jnp.zeros((1, O_pad), jnp.float32).at[:, :O].set(
        (jnp.asarray(lin_bias) + jnp.asarray(extra_bias))
        .reshape(1, O).astype(jnp.float32))

    return {"emb": emb_pad, "w": w_pad, "bias": fused_bias, "O": O}


def cbow_forward(indices, params, *, batch_tile=256):
    """CBOW forward: sum-of-embeddings -> linear -> + bias.  Returns (B, O) f32."""
    B, S = indices.shape
    emb_pad, w_pad, fused_bias = params["emb"], params["w"], params["bias"]
    O = params["O"]
    V_pad, E_pad = emb_pad.shape
    O_pad = w_pad.shape[1]

    # Batch tile: big enough to feed the MXU M dimension, but keep >= 2 grid
    # steps when the batch allows it so both v7x TensorCores get work.
    TB = min(batch_tile, _round_up(B, 8))
    if _round_up(B, TB) == TB and TB >= 16:
        TB = _round_up(TB // 2, 8)
    B_pad = _round_up(B, TB)

    # Per-call input prep only (parameters were padded once in prepare_*).
    ids = jnp.zeros((B_pad, S), jnp.int32).at[:B].set(indices.astype(jnp.int32))

    # Scoped-VMEM limit sized from the actual residents (+ headroom).
    resident = (TB * S * 4                                   # ids block
                + emb_pad.size * 2                            # bf16 table
                + w_pad.size * 2                              # bf16 weight
                + fused_bias.size * 4
                + TB * O_pad * 4                              # output block
                + TB * V_pad * 4                              # counts intermediate
                + TB * E_pad * 4)                             # summed intermediate
    vmem_limit = int(min(max(2 * resident + (8 << 20), 16 << 20), 100 << 20))

    kernel = functools.partial(_cbow_kernel, S, V_pad)

    out = pl.pallas_call(
        kernel,
        out_shape=jax.ShapeDtypeStruct((B_pad, O_pad), jnp.float32),
        grid=(B_pad // TB,),
        in_specs=[
            pl.BlockSpec((TB, S), lambda bt: (bt, 0)),           # token ids
            pl.BlockSpec((V_pad, E_pad), lambda bt: (0, 0)),     # table (bf16)
            pl.BlockSpec((E_pad, O_pad), lambda bt: (0, 0)),     # W (bf16)
            pl.BlockSpec((1, O_pad), lambda bt: (0, 0)),         # fused bias
        ],
        out_specs=pl.BlockSpec((TB, O_pad), lambda bt: (bt, 0)),
        compiler_params=pltpu.CompilerParams(
            dimension_semantics=("parallel",),   # batch tiles split across TCs
            vmem_limit_bytes=vmem_limit,
        ),
    )(ids, emb_pad, w_pad, fused_bias)

    return out[:B, :O]


if __name__ == "__main__":
    # Small synthetic configuration consistent with the module's forward.
    vocab_size = 64
    embedding_dim = 32
    output_dim = 16
    batch = 8
    seq = 8  # context window size

    key = jax.random.PRNGKey(0)
    k_idx, k_emb, k_w, k_b, k_b2 = jax.random.split(key, 5)

    indices = jax.random.randint(k_idx, (batch, seq), 0, vocab_size,
                                 dtype=jnp.int32)
    emb_table = jax.random.normal(k_emb, (vocab_size, embedding_dim),
                                  dtype=jnp.float32)
    # PyTorch Linear stores weight as (O, E); we carry W = weight.T, shape (E, O).
    weight = (jax.random.normal(k_w, (output_dim, embedding_dim),
                                dtype=jnp.float32)
              * (1.0 / jnp.sqrt(embedding_dim))).T
    lin_bias = (jax.random.normal(k_b, (1, output_dim), dtype=jnp.float32)
                * (1.0 / jnp.sqrt(embedding_dim)))
    # The module's self.bias initializes to zeros; use a nonzero "trained"
    # value so the fused-bias path is actually exercised.
    extra_bias = jax.random.normal(k_b2, (1, output_dim), dtype=jnp.float32) * 0.1

    # Parameter padding/casting is done once, outside the per-call path.
    params = prepare_cbow_params(emb_table, weight, lin_bias, extra_bias)

    logits = cbow_forward(indices, params)
    logits = jax.block_until_ready(logits)

    # Pure-JAX f32 reference.
    ref = (emb_table[indices].sum(axis=1) @ weight) + lin_bias + extra_bias
    assert logits.shape == (batch, output_dim)
    max_err = float(jnp.max(jnp.abs(logits - ref)))
    # bf16 table / MXU operands -> allow a few bf16 ulps vs the f32 reference.
    assert jnp.allclose(logits, ref, rtol=2e-2, atol=1e-1), max_err

    print("KERNEL_OK")
</pallas_src>

<mosaic_0001>
module attributes {stable_mosaic.version = 11 : i64} {
  func.func @_cbow_kernel(%arg0: i32, %arg1: memref<8x8xi32, #tpu.memory_space<vmem>>, %arg2: memref<128x128xbf16, #tpu.memory_space<vmem>>, %arg3: memref<128x128xbf16, #tpu.memory_space<vmem>>, %arg4: memref<1x128xf32, #tpu.memory_space<vmem>>, %arg5: memref<8x128xf32, #tpu.memory_space<vmem>>) attributes {dimension_semantics = [#tpu.dimension_semantics<parallel>], iteration_bounds = array<i64: 1>, scalar_prefetch = 0 : i64, scratch_operands = 0 : i64, tpu.core_type = #tpu.core_type<tc>, window_params = [{transform_indices = @transform_0, window_bounds = array<i64: 8, 8>}, {pipeline_mode = #tpu.pipeline_mode<synchronous>, transform_indices = @transform_1, window_bounds = array<i64: 128, 128>}, {pipeline_mode = #tpu.pipeline_mode<synchronous>, transform_indices = @transform_2, window_bounds = array<i64: 128, 128>}, {pipeline_mode = #tpu.pipeline_mode<synchronous>, transform_indices = @transform_3, window_bounds = array<i64: 1, 128>}, {transform_indices = @transform_4, window_bounds = array<i64: 8, 128>}]} {
    %c0 = arith.constant 0 : index
    %c0_0 = arith.constant 0 : index
    %0 = vector.load %arg1[%c0, %c0_0] : memref<8x8xi32, #tpu.memory_space<vmem>>, vector<8x8xi32>
    %1 = tpu.iota {dimensions = array<i32: 1>} : vector<8x128xi32>
    %cst = arith.constant 0.000000e+00 : f32
    %2 = vector.broadcast %cst : f32 to vector<8x128xf32>
    %3 = vector.extract_strided_slice %0 {offsets = [0, 0], sizes = [8, 1], strides = [1, 1]} : vector<8x8xi32> to vector<8x1xi32>
    %4 = vector.broadcast %3 : vector<8x1xi32> to vector<8x128xi32>
    %5 = arith.cmpi eq, %4, %1 : vector<8x128xi32>
    %6 = arith.extui %5 : vector<8x128xi1> to vector<8x128xi32>
    %7 = arith.sitofp %6 : vector<8x128xi32> to vector<8x128xf32>
    %8 = arith.addf %2, %7 : vector<8x128xf32>
    %9 = vector.extract_strided_slice %0 {offsets = [0, 1], sizes = [8, 1], strides = [1, 1]} : vector<8x8xi32> to vector<8x1xi32>
    %10 = vector.broadcast %9 : vector<8x1xi32> to vector<8x128xi32>
    %11 = arith.cmpi eq, %10, %1 : vector<8x128xi32>
    %12 = arith.extui %11 : vector<8x128xi1> to vector<8x128xi32>
    %13 = arith.sitofp %12 : vector<8x128xi32> to vector<8x128xf32>
    %14 = arith.addf %8, %13 : vector<8x128xf32>
    %15 = vector.extract_strided_slice %0 {offsets = [0, 2], sizes = [8, 1], strides = [1, 1]} : vector<8x8xi32> to vector<8x1xi32>
    %16 = vector.broadcast %15 : vector<8x1xi32> to vector<8x128xi32>
    %17 = arith.cmpi eq, %16, %1 : vector<8x128xi32>
    %18 = arith.extui %17 : vector<8x128xi1> to vector<8x128xi32>
    %19 = arith.sitofp %18 : vector<8x128xi32> to vector<8x128xf32>
    %20 = arith.addf %14, %19 : vector<8x128xf32>
    %21 = vector.extract_strided_slice %0 {offsets = [0, 3], sizes = [8, 1], strides = [1, 1]} : vector<8x8xi32> to vector<8x1xi32>
    %22 = vector.broadcast %21 : vector<8x1xi32> to vector<8x128xi32>
    %23 = arith.cmpi eq, %22, %1 : vector<8x128xi32>
    %24 = arith.extui %23 : vector<8x128xi1> to vector<8x128xi32>
    %25 = arith.sitofp %24 : vector<8x128xi32> to vector<8x128xf32>
    %26 = arith.addf %20, %25 : vector<8x128xf32>
    %27 = vector.extract_strided_slice %0 {offsets = [0, 4], sizes = [8, 1], strides = [1, 1]} : vector<8x8xi32> to vector<8x1xi32>
    %28 = vector.broadcast %27 : vector<8x1xi32> to vector<8x128xi32>
    %29 = arith.cmpi eq, %28, %1 : vector<8x128xi32>
    %30 = arith.extui %29 : vector<8x128xi1> to vector<8x128xi32>
    %31 = arith.sitofp %30 : vector<8x128xi32> to vector<8x128xf32>
    %32 = arith.addf %26, %31 : vector<8x128xf32>
    %33 = vector.extract_strided_slice %0 {offsets = [0, 5], sizes = [8, 1], strides = [1, 1]} : vector<8x8xi32> to vector<8x1xi32>
    %34 = vector.broadcast %33 : vector<8x1xi32> to vector<8x128xi32>
    %35 = arith.cmpi eq, %34, %1 : vector<8x128xi32>
    %36 = arith.extui %35 : vector<8x128xi1> to vector<8x128xi32>
    %37 = arith.sitofp %36 : vector<8x128xi32> to vector<8x128xf32>
    %38 = arith.addf %32, %37 : vector<8x128xf32>
    %39 = vector.extract_strided_slice %0 {offsets = [0, 6], sizes = [8, 1], strides = [1, 1]} : vector<8x8xi32> to vector<8x1xi32>
    %40 = vector.broadcast %39 : vector<8x1xi32> to vector<8x128xi32>
    %41 = arith.cmpi eq, %40, %1 : vector<8x128xi32>
    %42 = arith.extui %41 : vector<8x128xi1> to vector<8x128xi32>
    %43 = arith.sitofp %42 : vector<8x128xi32> to vector<8x128xf32>
    %44 = arith.addf %38, %43 : vector<8x128xf32>
    %45 = vector.extract_strided_slice %0 {offsets = [0, 7], sizes = [8, 1], strides = [1, 1]} : vector<8x8xi32> to vector<8x1xi32>
    %46 = vector.broadcast %45 : vector<8x1xi32> to vector<8x128xi32>
    %47 = arith.cmpi eq, %46, %1 : vector<8x128xi32>
    %48 = arith.extui %47 : vector<8x128xi1> to vector<8x128xi32>
    %49 = arith.sitofp %48 : vector<8x128xi32> to vector<8x128xf32>
    %50 = arith.addf %44, %49 : vector<8x128xf32>
    %51 = arith.truncf %50 : vector<8x128xf32> to vector<8x128xbf16>
    %c0_1 = arith.constant 0 : index
    %c0_2 = arith.constant 0 : index
    %52 = vector.load %arg2[%c0_1, %c0_2] : memref<128x128xbf16, #tpu.memory_space<vmem>>, vector<128x128xbf16>
    %cst_3 = arith.constant dense<0.000000e+00> : vector<8x128xf32>
    %53 = tpu.matmul %51, %52, %cst_3 {dimension_numbers = #tpu.dot_dimension_numbers<[1], [0], [0], [1], [0, 0, 1, 1], [], []>} : vector<8x128xbf16>, vector<128x128xbf16>, vector<8x128xf32> -> vector<8x128xf32>
    %54 = arith.truncf %53 : vector<8x128xf32> to vector<8x128xbf16>
    %c0_4 = arith.constant 0 : index
    %c0_5 = arith.constant 0 : index
    %55 = vector.load %arg3[%c0_4, %c0_5] : memref<128x128xbf16, #tpu.memory_space<vmem>>, vector<128x128xbf16>
    %cst_6 = arith.constant dense<0.000000e+00> : vector<8x128xf32>
    %56 = tpu.matmul %54, %55, %cst_6 {dimension_numbers = #tpu.dot_dimension_numbers<[1], [0], [0], [1], [0, 0, 1, 1], [], []>} : vector<8x128xbf16>, vector<128x128xbf16>, vector<8x128xf32> -> vector<8x128xf32>
    %c0_7 = arith.constant 0 : index
    %c0_8 = arith.constant 0 : index
    %57 = vector.load %arg4[%c0_7, %c0_8] : memref<1x128xf32, #tpu.memory_space<vmem>>, vector<1x128xf32>
    %58 = vector.broadcast %57 : vector<1x128xf32> to vector<8x128xf32>
    %59 = arith.addf %56, %58 : vector<8x128xf32>
    %c0_9 = arith.constant 0 : index
    %c0_10 = arith.constant 0 : index
    %60 = vector.load %arg5[%c0_9, %c0_10] : memref<8x128xf32, #tpu.memory_space<vmem>>, vector<8x128xf32>
    tpu.vector_store %arg5[%c0_9, %c0_10], %59 {strides = array<i32>} : memref<8x128xf32, #tpu.memory_space<vmem>>, vector<8x128xf32>,
    return
  }
  func.func @transform_0(%arg0: i32) -> (i32, i32) {
    %c0_i32 = arith.constant 0 : i32
    %c0_i32_0 = arith.constant 0 : i32
    return %arg0, %c0_i32 : i32, i32
  }
  func.func @transform_1(%arg0: i32) -> (i32, i32) {
    %c0_i32 = arith.constant 0 : i32
    %c0_i32_0 = arith.constant 0 : i32
    %c0_i32_1 = arith.constant 0 : i32
    return %c0_i32, %c0_i32_0 : i32, i32
  }
  func.func @transform_2(%arg0: i32) -> (i32, i32) {
    %c0_i32 = arith.constant 0 : i32
    %c0_i32_0 = arith.constant 0 : i32
    %c0_i32_1 = arith.constant 0 : i32
    return %c0_i32, %c0_i32_0 : i32, i32
  }
  func.func @transform_3(%arg0: i32) -> (i32, i32) {
    %c0_i32 = arith.constant 0 : i32
    %c0_i32_0 = arith.constant 0 : i32
    %c0_i32_1 = arith.constant 0 : i32
    return %c0_i32, %c0_i32_0 : i32, i32
  }
  func.func @transform_4(%arg0: i32) -> (i32, i32) {
    %c0_i32 = arith.constant 0 : i32
    %c0_i32_0 = arith.constant 0 : i32
    return %arg0, %c0_i32 : i32, i32
  }
}

</mosaic_0001>

<bundles_post_ra>
// kernel: tpu_custom_call.1
= control target key start
LH: loop header
LB: loop body
LE: loop exit
PB: predicated region body
PF: predicated region fallthrough
CT: control target
= control target key end

     0   :  { %9 = vsyncpa [#allocation3], 0  ;;  %s693_s0 = inlined_call_operand.hbm [shape: s32[8,8], index: 0, kind: input, shape index: {}]   ;;  %s694_s1 = inlined_call_operand.hbm [shape: bf16[128,128], index: 1, kind: input, shape index: {}]   ;;  %s695_s2 = inlined_call_operand.hbm [shape: bf16[128,128], index: 2, kind: input, shape index: {}]   ;;  %s696_s3 = inlined_call_operand.vmem [shape: f32[1,128], index: 3, kind: input, shape index: {}]   ;;  %s697_s4 = inlined_call_operand.hbm [shape: f32[8,128], index: 4, kind: output, shape index: {}]  }
   0x1   :  { %10 = vsyncpa [#allocation6], 0 }
   0x2   :  { %11 = vsyncpa [#allocation4], 0  ;;  %s569_s15 = smov [#allocation5]   ;;  %s475_s19 = scalar_lea.hbm %s694_s1, 1024 }
   0x3   :  { %s27_s16 = sshll.u32 %s569_s15, 4  ;;  %p476_p0 = scmp.ne.s32.totalorder %s694_s1, %s475_s19  ;;  %s28_s16 = int_to_ptr.vmem [resolvable:$true] %s27_s16 }
   0x4   :  { %p479_p1 = scmp.lt.u32.totalorder %s475_s19, %s694_s1 }
   0x6   :  { %p481_p2 = pnand %p479_p1, %p476_p0 }
   0x8   :  { %484 = shalt.err (!%p481_p2)
}
   0x9   :  { %s485_s24 = scalar_lea.vmem %s28_s16, 1024  ;;  %p490_p4 = scmp.lt.s32.totalorder %s28_s16, %s28_s16 }
   0xa   :  { %p486_p3 = scmp.ne.s32.totalorder %s28_s16, %s485_s24  ;;  %p491_p5 = scmp.lt.s32.totalorder %s485_s24, %s485_s24 }
   0xc   :  { %p492_p6 = por %p491_p5, %p490_p4 }
   0xe   :  { %p493_p7 = pnand %p492_p6, %p486_p3 }
  0x10   :  { %496 = shalt.err (!%p493_p7)
}
  0x11   :  { %s570_s25 = smov 64   ;;  %s571_s26 = smov 4  }
  0x12   :  { %33 = dma.hbm_to_vmem [thread:$0]  %s694_s1, 1024, %s28_s16, [#allocation6], %s570_s25, %s570_s25, %s571_s26  }
  0x13   :  { %s572_s29 = smov [#allocation2]   ;;  %s573_s5 = smov [#allocation7]  }
  0x14   :  { %s18_s30 = sshll.u32 %s572_s29, 4  ;;  %s39_s6 = sshll.u32 %s573_s5, 4  ;;  %s19_s30 = int_to_ptr.vmem [resolvable:$true] %s18_s30  ;;  %s40_s6 = int_to_ptr.vmem [resolvable:$true] %s39_s6 }
  0x15   :  { %s497_s9 = scalar_lea.hbm %s693_s0, 128 }
  0x16   :  { %p498_p8 = scmp.ne.s32.totalorder %s693_s0, %s497_s9  ;;  %p501_p9 = scmp.lt.u32.totalorder %s497_s9, %s693_s0 }
  0x18   :  { %p503_p10 = pnand %p501_p9, %p498_p8 }
  0x1a   :  { %506 = shalt.err (!%p503_p10)
}
  0x1b   :  { %s507_s1 = scalar_lea.vmem %s19_s30, 128  ;;  %p512_p12 = scmp.lt.s32.totalorder %s19_s30, %s19_s30 }
  0x1c   :  { %p508_p11 = scmp.ne.s32.totalorder %s19_s30, %s507_s1  ;;  %p513_p13 = scmp.lt.s32.totalorder %s507_s1, %s507_s1 }
  0x1e   :  { %p514_p0 = por %p513_p13, %p512_p12 }
  0x20   :  { %p515_p1 = pnand %p514_p0, %p508_p11 }
  0x22   :  { %518 = shalt.err (!%p515_p1)
}
  0x23   :  { %21 = dma.hbm_to_vmem [thread:$0]  %s693_s0, 128, %s19_s30, [#allocation3]  }
  0x24   :  { %s519_s18 = scalar_lea.hbm %s695_s2, 1024 }
  0x25   :  { %p520_p2 = scmp.ne.s32.totalorder %s695_s2, %s519_s18  ;;  %p523_p3 = scmp.lt.u32.totalorder %s519_s18, %s695_s2 }
  0x27   :  { %p525_p4 = pnand %p523_p3, %p520_p2 }
  0x29   :  { %528 = shalt.err (!%p525_p4)
}
  0x2a   :  { %s529_s23 = scalar_lea.vmem %s40_s6, 1024  ;;  %p534_p6 = scmp.lt.s32.totalorder %s40_s6, %s40_s6 }
  0x2b   :  { %p530_p5 = scmp.ne.s32.totalorder %s40_s6, %s529_s23  ;;  %p535_p7 = scmp.lt.s32.totalorder %s529_s23, %s529_s23 }
  0x2d   :  { %p536_p8 = por %p535_p7, %p534_p6 }
  0x2f   :  { %p537_p9 = pnand %p536_p8, %p530_p5 }
  0x31   :  { %540 = shalt.err (!%p537_p9)
}
  0x32   :  { %45 = dma.hbm_to_vmem [thread:$0]  %s695_s2, 1024, %s40_s6, [#allocation6], %s570_s25, %s570_s25, %s571_s26  }
  0x33   :  { %563 = dma.done.wait [#allocation3], 128  }
  0x34   :  { %564 = vsyncadd [#allocation3], 4294967168 }
  0x35   :  { %565 = dma.done.wait [#allocation6], 2048  }
  0x36   :  { %566 = vsyncadd [#allocation6], 4294965248  ;;  %v574_v0 = vmov 2   ;;  %v575_v1 = vmov 0   ;;  %v576_v2 = vmov 0.0   ;;  %v58_v3 = vld [vmem:[#allocation2] sm:$0xff]  ;;  %v59_v25 = vlaneseq }
  0x37   :  { %452 = vset.pattern.permute.xlu1 %v574_v0  ;;  %450 = vset.pattern.permute.xlu0 %v575_v1  ;;  %v459_v4 = vld [vmem:[#allocation5] sm:$0xff]   ;;  %v460_v5 = vld [vmem:[#allocation5 + $0x8] sm:$0xff]   ;;  %v577_v6 = vmov 3   ;;  %v578_v7 = vmov 1   ;;  %v461_v8 = vld [vmem:[#allocation5 + $0x10] sm:$0xff]   ;;  %v579_v9 = vmov 4  }
  0x38   :  { %394 = vmatprep.subr.bf16.mxu0 %v576_v2  ;;  %414 = vmatprep.subr.bf16.mxu1 %v576_v2  ;;  %v580_v10 = vmov 5   ;;  %v462_v11 = vld [vmem:[#allocation5 + $0x18] sm:$0xff]   ;;  %v581_v12 = vmov 6   ;;  %v582_v13 = vmov 7   ;;  %v463_v14 = vld [vmem:[#allocation5 + $0x20] sm:$0xff]   ;;  %v464_v15 = vld [vmem:[#allocation5 + $0x28] sm:$0xff]  }
  0x39   :  { %76 = vperm.xlu1 %452, %v58_v3   ;;  %62 = vperm.xlu0 %450, %v58_v3   ;;  %v465_v16 = vld [vmem:[#allocation5 + $0x30] sm:$0xff]   ;;  %vm583_vm0 = vmmov 0   ;;  %v467_v17 = vld [vmem:[#allocation7] sm:$0xff]   ;;  %v466_v18 = vld [vmem:[#allocation5 + $0x38] sm:$0xff]   ;;  %v60_v28 = vand.u32 127, %v59_v25  ;;  %s584_s26 = smov [#allocation8]  }
  0x3a   :  { %395 = vmatpush3.bf16.msra.mxu0 %v459_v4  ;;  %410 = vmatprep.mubr.msk.bf16.mxu0 %vm583_vm0, %v576_v2  ;;  %v468_v19 = vld [vmem:[#allocation7 + $0x8] sm:$0xff]   ;;  %v469_v20 = vld [vmem:[#allocation7 + $0x10] sm:$0xff]   ;;  %v470_v21 = vld [vmem:[#allocation7 + $0x18] sm:$0xff]   ;;  %s341_s27 = sshll.u32 %s584_s26, 4  ;;  %s342_s27 = int_to_ptr.vmem [resolvable:$true] %s341_s27 }
  0x3b   :  { %396 = vmatprep.subr.bf16.mxu0 %v576_v2  ;;  %430 = vmatprep.mubr.msk.bf16.mxu1 %vm583_vm0, %v576_v2  ;;  %v471_v22 = vld [vmem:[#allocation7 + $0x20] sm:$0xff]   ;;  %v472_v23 = vld [vmem:[#allocation7 + $0x28] sm:$0xff]   ;;  %v473_v24 = vld [vmem:[#allocation7 + $0x30] sm:$0xff]   ;;  %s541_s28 = scalar_lea.vmem %s342_s27, 128  ;;  %p546_p11 = scmp.lt.s32.totalorder %s342_s27, %s342_s27 }
  0x3c   :  { %415 = vmatpush3.bf16.msra.mxu1 %v467_v17  ;;  %v474_v51 = vld [vmem:[#allocation7 + $0x38] sm:$0xff]   ;;  %p542_p10 = scmp.ne.s32.totalorder %s342_s27, %s541_s28  ;;  %p547_p12 = scmp.lt.s32.totalorder %s541_s28, %s541_s28 }
  0x3d   :  { %453 = vset.pattern.permute.xlu1 %v577_v6  ;;  %451 = vset.pattern.permute.xlu0 %v578_v7  ;;  %v367_v57 = vld [vmem:[%s696_s3] ss:$0 sm:$0xff] }
  0x3e   :  { %83 = vperm.xlu1 %453, %v58_v3   ;;  %69 = vperm.xlu0 %451, %v58_v3   ;;  %p548_p13 = por %p547_p12, %p546_p11 }
  0x3f   :  { %397 = vmatpush3.bf16.msra.mxu0 %v460_v5  ;;  %416 = vmatprep.subr.bf16.mxu1 %v576_v2 }
  0x40   :  { %398 = vmatprep.subr.bf16.mxu0 %v576_v2  ;;  %417 = vmatpush3.bf16.msra.mxu1 %v468_v19  ;;  %p549_p0 = pnand %p548_p13, %p542_p10 }
  0x41   :  { %418 = vmatprep.subr.bf16.mxu1 %v576_v2 }
  0x42   :  { %454 = vset.pattern.permute.xlu1 %v579_v9  ;;  %455 = vset.pattern.permute.xlu0 %v580_v10 }
  0x43   :  { %90 = vperm.xlu1 %454, %v58_v3   ;;  %97 = vperm.xlu0 %455, %v58_v3  }
  0x44   :  { %399 = vmatpush3.bf16.msra.mxu0 %v461_v8  ;;  %419 = vmatpush3.bf16.msra.mxu1 %v469_v20 }
  0x45   :  { %400 = vmatprep.subr.bf16.mxu0 %v576_v2  ;;  %420 = vmatprep.subr.bf16.mxu1 %v576_v2 }
  0x47   :  { %456 = vset.pattern.permute.xlu1 %v581_v12  ;;  %458 = vset.pattern.permute.xlu0 %v582_v13 }
  0x48   :  { %104 = vperm.xlu1 %456, %v58_v3   ;;  %401 = vmatpush3.bf16.msra.mxu0 %v462_v11 }
  0x49   :  { %402 = vmatprep.subr.bf16.mxu0 %v576_v2  ;;  %421 = vmatpush3.bf16.msra.mxu1 %v470_v21 }
  0x4a   :  { %422 = vmatprep.subr.bf16.mxu1 %v576_v2 }
  0x4c   :  { %457 = vset.pattern.permute.xlu1 %v582_v13  ;;  %403 = vmatpush3.bf16.msra.mxu0 %v463_v14 }
  0x4d   :  { %111 = vperm.xlu1 %457, %v58_v3   ;;  %404 = vmatprep.subr.bf16.mxu0 %v576_v2 }
  0x4e   :  { %423 = vmatpush3.bf16.msra.mxu1 %v471_v22 }
  0x4f   :  { %424 = vmatprep.subr.bf16.mxu1 %v576_v2 }
  0x50   :  { %405 = vmatpush3.bf16.msra.mxu0 %v464_v15 }
  0x51   :  { %406 = vmatprep.subr.bf16.mxu0 %v576_v2 }
  0x52   :  { %425 = vmatpush3.bf16.msra.mxu1 %v472_v23 }
  0x53   :  { %426 = vmatprep.subr.bf16.mxu1 %v576_v2 }
  0x54   :  { %407 = vmatpush3.bf16.msra.mxu0 %v465_v16 }
  0x55   :  { %408 = vmatprep.subr.bf16.mxu0 %v576_v2 }
  0x56   :  { %427 = vmatpush3.bf16.msra.mxu1 %v473_v24 }
  0x57   :  { %428 = vmatprep.subr.bf16.mxu1 %v576_v2 }
  0x58   :  { %409 = vmatpush3.bf16.msra.mxu0 %v466_v18 }
  0x5a   :  { %429 = vmatpush3.bf16.msra.mxu1 %v474_v51 }
  0xb8   :  { %v77_v26 = vpop.permute.xlu1 %76  ;;  %v63_v27 = vpop.permute.xlu0 %62 }
  0xb9   :  { %vm64_vm1 = vcmp.eq.s32.totalorder %v63_v27, %v60_v28  ;;  %vm78_vm2 = vcmp.eq.s32.totalorder %v77_v26, %v60_v28 }
  0xba   :  { %v351_v31 = vsel %vm64_vm1, 1.0, %v576_v2  ;;  %v353_v34 = vsel %vm78_vm2, 1.0, %v576_v2 }
  0xbd   :  { %v84_v29 = vpop.permute.xlu1 %83  ;;  %v70_v30 = vpop.permute.xlu0 %69 }
  0xbe   :  { %vm71_vm3 = vcmp.eq.s32.totalorder %v70_v30, %v60_v28  ;;  %vm85_vm4 = vcmp.eq.s32.totalorder %v84_v29, %v60_v28 }
  0xbf   :  { %v352_v32 = vsel %vm71_vm3, 1.0, %v576_v2  ;;  %v354_v38 = vsel %vm85_vm4, 1.0, %v576_v2 }
  0xc0   :  { %v74_v33 = vadd.f32 %v352_v32, %v351_v31 }
  0xc2   :  { %v81_v35 = vadd.f32 %v353_v34, %v74_v33  ;;  %v91_v36 = vpop.permute.xlu1 %90  ;;  %v98_v37 = vpop.permute.xlu0 %97 }
  0xc3   :  { %vm92_vm5 = vcmp.eq.s32.totalorder %v91_v36, %v60_v28  ;;  %vm99_vm6 = vcmp.eq.s32.totalorder %v98_v37, %v60_v28 }
  0xc4   :  { %v88_v39 = vadd.f32 %v354_v38, %v81_v35  ;;  %v355_v40 = vsel %vm92_vm5, 1.0, %v576_v2  ;;  %v356_v42 = vsel %vm99_vm6, 1.0, %v576_v2 }
  0xc6   :  { %v95_v41 = vadd.f32 %v355_v40, %v88_v39 }
  0xc7   :  { %v105_v43 = vpop.permute.xlu1 %104 }
  0xc8   :  { %vm106_vm7 = vcmp.eq.s32.totalorder %v105_v43, %v60_v28  ;;  %v102_v44 = vadd.f32 %v356_v42, %v95_v41 }
  0xc9   :  { %v357_v45 = vsel %vm106_vm7, 1.0, %v576_v2 }
  0xca   :  { %v109_v47 = vadd.f32 %v357_v45, %v102_v44 }
  0xcc   :  { %v112_v46 = vpop.permute.xlu1 %111 }
  0xcd   :  { %vm113_vm8 = vcmp.eq.s32.totalorder %v112_v46, %v60_v28 }
  0xce   :  { %v358_v48 = vsel %vm113_vm8, 1.0, %v576_v2 }
  0xcf   :  { %v116_v49 = vadd.f32 %v358_v48, %v109_v47 }
  0xd1   :  { %v117_v50 = vpack.c.bf16 %v116_v49, %v116_v49 }
  0xd3   :  { %411 = vmatmul.mubr.bf16.vlgmr.msra.gmra.mrb[0].mxu0 %v117_v50 }
 0x1a6   :  { %v216_v52 = vpop.f32.mrb[0].mxu0 }
 0x1a7   :  { %v222_v53 = vpack.c.bf16 %v216_v52, %v216_v52  ;;  %v412_v54 = vpop.f32.mrb[1].mxu0 }
 0x1a8   :  { %v219_v55 = vpop.f32.mrb[2].mxu0 }
 0x1a9   :  { %v413_v56 = vpop.f32.mrb[3].mxu0  ;;  %431 = vmatmul.mubr.bf16.vlgmr.msra.gmra.mrb[0].mxu1 %v222_v53 }
 0x27c   :  { %v328_v58 = vpop.f32.mrb[0].mxu1 }
 0x27d   :  { %v329_v59 = vadd.f32 %v367_v57, %v328_v58  ;;  %v432_v60 = vpop.f32.mrb[1].mxu1 }
 0x27e   :  { %v331_v61 = vpop.f32.mrb[2].mxu1 }
 0x27f   :  { %334 = vst [vmem:[#allocation8] sm:$0xff] %v329_v59  ;;  %v433_v62 = vpop.f32.mrb[3].mxu1 }
 0x280   :  { %552 = shalt.err (!%p549_p0)
}
 0x281   :  { %s553_s3 = scalar_lea.hbm %s697_s4, 128 }
 0x282   :  { %p554_p1 = scmp.ne.s32.totalorder %s697_s4, %s553_s3  ;;  %p557_p2 = scmp.lt.u32.totalorder %s553_s3, %s697_s4 }
 0x284   :  { %p559_p3 = pnand %p557_p2, %p554_p1 }
 0x286   :  { %562 = shalt.err (!%p559_p3)
}
 0x287   :  { %344 = dma.vmem_to_hbm [thread:$0]  %s342_s27, 128, %s697_s4, [#allocation4]  }
 0x288   :  { %567 = dma.done.wait [#allocation4], 128  }
 0x289   :  { %568 = vsyncadd [#allocation4], 4294967168 }
 0x28a   :  { %348 = vsyncpa [#allocation3], 1 }
 0x28b   :  { %349 = vsyncpa [#allocation6], 1 }
 0x28c   :  { %350 = vsyncpa [#allocation4], 1 }

</bundles_post_ra>
